<compile_context>
chip_gen: v5e
topology: v5e:2x2
jax: 0.10.0
libtpu: 0.0.40
codegen_flags: <defaults>
</compile_context>

<pallas_src>
import jax
import jax.numpy as jnp
from jax import lax
from jax.experimental import pallas as pl
from jax.experimental.pallas import tpu as pltpu


_SUB = 8  # sublane strip height inside the kernel (one f32 vreg worth of sublanes)


def _bellows_kernel(x_ref, w1_ref, b1_ref, w2_ref, b2_ref, o_ref):
    """Per-gene 1->E->1 MLP on one (tb, tg) tile; genes on lanes, batch on sublanes.

    x_ref : (tb, tg)   input tile (batch rows x gene columns)
    w1_ref: (E, tg)    expand weights (one row per expansion unit)
    b1_ref: (E, tg)    expand biases
    w2_ref: (E, tg)    shrink weights
    b2_ref: (1, tg)    shrink bias
    o_ref : (tb, tg)   output tile
    """
    tb, tg = x_ref.shape
    n_expansion = w1_ref.shape[0]

    def do_strip(r0, rows):
        # Per-strip working set (x, acc, h ~ 4 vregs each at tg=512) stays in registers,
        # so the unrolled E-loop is pure full-width VALU work with no spills.
        x = x_ref[pl.ds(r0, rows), :]                                  # (rows, tg)
        # Fold bias2 into the accumulator init; keep the accumulator in f32.
        acc = jnp.broadcast_to(b2_ref[...].astype(jnp.float32), (rows, tg))
        for e in range(n_expansion):                                   # static unroll over E
            w1e = w1_ref[pl.ds(e, 1), :]                               # (1, tg) -> bcast over rows
            b1e = b1_ref[pl.ds(e, 1), :]
            w2e = w2_ref[pl.ds(e, 1), :]
            h = jnp.maximum(x * w1e + b1e, 0)                          # expand + ReLU
            acc = acc + h * w2e                                        # shrink accumulation (f32)
        o_ref[pl.ds(r0, rows), :] = jnp.maximum(acc, 0.0).astype(o_ref.dtype)

    n_full = tb // _SUB
    if n_full > 0:
        def body(s, carry):
            do_strip(pl.multiple_of(s * _SUB, _SUB), _SUB)
            return carry
        lax.fori_loop(0, n_full, body, 0)
    tail = tb % _SUB
    if tail:                                                           # static remainder strip
        do_strip(n_full * _SUB, tail)


def _pick_gene_tile(n_genes, tile_g):
    """Largest multiple of 128 that divides n_genes and is <= tile_g (None if impossible)."""
    if n_genes % 128 != 0:
        return None
    t = (min(tile_g, n_genes) // 128) * 128
    while t >= 128:
        if n_genes % t == 0:
            return t
        t -= 128
    return None


def parallel_bellows_forward(x, w1, b1, w2, b2, n_genes, n_tech,
                             tile_b=512, tile_g=512,
                             compute_dtype=jnp.float32):
    """Forward pass of ParallelBellowsLayers.

    out[t, b, j] = relu(b2[g] + sum_e relu(x[b, g]*w1[g, e] + b1[g, e]) * w2[g, e]),
    g = t*n_genes + j.  Returns (n_tech, B, n_genes).
    """
    cols = n_genes * 2                         # the module's forward hard-codes "* 2"
    G = n_genes * n_tech
    assert cols == G, "ParallelBellowsLayers.forward implicitly requires n_tech == 2"

    out_dtype = x.dtype
    xg = x.reshape(-1, cols).astype(compute_dtype)             # (B, G): free reshape, no transpose
    B = xg.shape[0]
    E = w1.shape[1]

    # One-time transposes of the (small) parameters into lane-major (E, G) / (1, G).
    w1t = jnp.asarray(w1).astype(compute_dtype).T              # (E, G)
    b1t = jnp.asarray(b1).astype(compute_dtype).T              # (E, G)
    w2t = jnp.asarray(w2).astype(compute_dtype).T              # (E, G)
    b2r = jnp.asarray(b2).astype(compute_dtype).reshape(1, G)  # (1, G)

    tb = B if B <= tile_b else tile_b                          # batch (sublane) tile

    tgn = _pick_gene_tile(n_genes, tile_g)
    if tgn is not None:
        # Fast path: emit (n_tech, B, n_genes) directly (no post-kernel transpose).
        # Grid = (tech, gene-tile, batch-tile); batch innermost so the weight blocks
        # keep the same block index across the inner sweep and are not re-fetched.
        gpt = n_genes // tgn                                   # gene blocks per tech
        grid = (n_tech, gpt, pl.cdiv(B, tb))
        return pl.pallas_call(
            _bellows_kernel,
            out_shape=jax.ShapeDtypeStruct((n_tech, B, n_genes), out_dtype),
            grid_spec=pltpu.PrefetchScalarGridSpec(
                num_scalar_prefetch=0,
                grid=grid,
                in_specs=[
                    pl.BlockSpec((tb, tgn), lambda t, j, b: (b, t * gpt + j)),   # x tile
                    pl.BlockSpec((E, tgn), lambda t, j, b: (0, t * gpt + j)),    # w1^T
                    pl.BlockSpec((E, tgn), lambda t, j, b: (0, t * gpt + j)),    # b1^T
                    pl.BlockSpec((E, tgn), lambda t, j, b: (0, t * gpt + j)),    # w2^T
                    pl.BlockSpec((1, tgn), lambda t, j, b: (0, t * gpt + j)),    # b2 row
                ],
                # leading (tech) dim squeezed out of the kernel view -> same 2-D kernel body
                out_specs=pl.BlockSpec((None, tb, tgn), lambda t, j, b: (t, b, j)),
            ),
            compiler_params=pltpu.CompilerParams(
                dimension_semantics=("parallel", "parallel", "arbitrary")),
        )(xg, w1t, b1t, w2t, b2r)

    # General fallback (n_genes not a multiple of 128): tile the flat (B, G) axis.
    # The final transpose costs one extra HBM pass over the output; only taken here.
    tg = G if G <= tile_g else tile_g
    n_gb, n_bb = pl.cdiv(G, tg), pl.cdiv(B, tb)
    if n_gb * n_bb == 1 and B >= 2 * _SUB:
        # Keep both v7x TensorCores busy: force at least two batch tiles.
        tb = max(_SUB, ((B // 2 + _SUB - 1) // _SUB) * _SUB)
        n_bb = pl.cdiv(B, tb)
    y = pl.pallas_call(
        _bellows_kernel,
        out_shape=jax.ShapeDtypeStruct((B, G), out_dtype),
        grid_spec=pltpu.PrefetchScalarGridSpec(
            num_scalar_prefetch=0,
            grid=(n_gb, n_bb),                                 # batch innermost
            in_specs=[
                pl.BlockSpec((tb, tg), lambda j, b: (b, j)),
                pl.BlockSpec((E, tg), lambda j, b: (0, j)),
                pl.BlockSpec((E, tg), lambda j, b: (0, j)),
                pl.BlockSpec((E, tg), lambda j, b: (0, j)),
                pl.BlockSpec((1, tg), lambda j, b: (0, j)),
            ],
            out_specs=pl.BlockSpec((tb, tg), lambda j, b: (b, j)),
        ),
        compiler_params=pltpu.CompilerParams(
            dimension_semantics=("parallel", "arbitrary")),
    )(xg, w1t, b1t, w2t, b2r)
    return y.reshape(B, n_tech, n_genes).transpose(1, 0, 2)


def _reference(x, w1, b1, w2, b2, n_genes, n_tech):
    """Pure-JAX transcription of the torch module's forward (for validation)."""
    xT = x.reshape(-1, n_genes * 2).T                                   # (G, B)
    h = jnp.maximum(xT[:, :, None] * w1[:, None, :] + b1[:, None, :], 0.0)
    y = jnp.maximum(jnp.sum(h * w2[:, None, :], axis=-1) + b2[:, None], 0.0)
    B = xT.shape[1]
    return y.T.reshape(B, n_tech, n_genes).transpose(1, 0, 2)           # (n_tech, B, n_genes)


if __name__ == "__main__":
    # --- aligned case: n_genes % 128 == 0 -> direct (n_tech, B, n_genes) output path
    n_genes, n_tech, n_expansion, batch = 256, 2, 16, 20
    G = n_genes * n_tech
    k1, k2, k3, k4, k5 = jax.random.split(jax.random.PRNGKey(0), 5)
    w1 = jax.random.normal(k1, (G, n_expansion), jnp.float32)
    b1 = jax.random.normal(k2, (G, n_expansion), jnp.float32)
    w2 = jax.random.normal(k3, (G, n_expansion), jnp.float32)
    b2 = jax.random.normal(k4, (G,), jnp.float32)
    x = jax.random.normal(k5, (batch, G), jnp.float32)
    ref = _reference(x, w1, b1, w2, b2, n_genes, n_tech)

    # (a) multi-tile grid: (tech=2, gene=2, batch=2), partial edge batch tile
    out_a = jax.block_until_ready(parallel_bellows_forward(
        x, w1, b1, w2, b2, n_genes, n_tech, tile_b=16, tile_g=128))
    assert out_a.shape == (n_tech, batch, n_genes)
    assert jnp.allclose(out_a, ref, atol=1e-4, rtol=1e-4)

    # (b) default tiles: single 20-row batch tile (2 full strips + a 4-row tail strip)
    out_b = jax.block_until_ready(parallel_bellows_forward(
        x, w1, b1, w2, b2, n_genes, n_tech))
    assert jnp.allclose(out_b, ref, atol=1e-4, rtol=1e-4)

    # (c) bf16 compute path (packed VPU on v6e/v7x), f32 accumulator, relaxed tolerance
    out_c = jax.block_until_ready(parallel_bellows_forward(
        x, w1, b1, w2, b2, n_genes, n_tech, compute_dtype=jnp.bfloat16))
    assert out_c.shape == (n_tech, batch, n_genes)
    assert jnp.allclose(out_c.astype(jnp.float32), ref, atol=0.75, rtol=0.1)

    # --- unaligned case: n_genes % 128 != 0 -> general fallback path
    n_genes2, n_expansion2, batch2 = 24, 8, 12
    G2 = n_genes2 * 2
    k6, k7, k8, k9, k10 = jax.random.split(jax.random.PRNGKey(1), 5)
    w1b = jax.random.normal(k6, (G2, n_expansion2), jnp.float32)
    b1b = jax.random.normal(k7, (G2, n_expansion2), jnp.float32)
    w2b = jax.random.normal(k8, (G2, n_expansion2), jnp.float32)
    b2b = jax.random.normal(k9, (G2,), jnp.float32)
    xb = jax.random.normal(k10, (batch2, G2), jnp.float32)
    out_d = jax.block_until_ready(parallel_bellows_forward(
        xb, w1b, b1b, w2b, b2b, n_genes2, n_tech))
    ref_d = _reference(xb, w1b, b1b, w2b, b2b, n_genes2, n_tech)
    assert out_d.shape == (n_tech, batch2, n_genes2)
    assert jnp.allclose(out_d, ref_d, atol=1e-4, rtol=1e-4)

    print("KERNEL_OK")
</pallas_src>

<mosaic_0001>
module attributes {stable_mosaic.version = 11 : i64} {
  func.func @_bellows_kernel(%arg0: i32, %arg1: i32, %arg2: i32, %arg3: memref<16x128xf32, #tpu.memory_space<vmem>>, %arg4: memref<16x128xf32, #tpu.memory_space<vmem>>, %arg5: memref<16x128xf32, #tpu.memory_space<vmem>>, %arg6: memref<16x128xf32, #tpu.memory_space<vmem>>, %arg7: memref<1x128xf32, #tpu.memory_space<vmem>>, %arg8: memref<1x16x128xf32, #tpu.memory_space<vmem>>) attributes {dimension_semantics = [#tpu.dimension_semantics<parallel>, #tpu.dimension_semantics<parallel>, #tpu.dimension_semantics<arbitrary>], iteration_bounds = array<i64: 2, 2, 2>, scalar_prefetch = 0 : i64, scratch_operands = 0 : i64, tpu.core_type = #tpu.core_type<tc>, window_params = [{transform_indices = @transform_0, window_bounds = array<i64: 16, 128>}, {transform_indices = @transform_1, window_bounds = array<i64: 16, 128>}, {transform_indices = @transform_2, window_bounds = array<i64: 16, 128>}, {transform_indices = @transform_3, window_bounds = array<i64: 16, 128>}, {transform_indices = @transform_4, window_bounds = array<i64: 1, 128>}, {transform_indices = @transform_5, window_bounds = array<i64: 1, 16, 128>}]} {
    %c0_i32 = arith.constant 0 : i32
    %c2_i32 = arith.constant 2 : i32
    %0 = arith.addi %c0_i32, %c2_i32 : i32
    %c1_i32 = arith.constant 1 : i32
    scf.for %arg9 = %c0_i32 to %0 step %c1_i32  : i32 {
      %c8_i32 = arith.constant 8 : i32
      %1 = arith.muli %arg9, %c8_i32 : i32
      %2 = tpu.assume_multiple %1, 8 : i32
      %3 = arith.index_cast %2 : i32 to index
      %c0 = arith.constant 0 : index
      %4 = vector.load %arg3[%3, %c0] : memref<16x128xf32, #tpu.memory_space<vmem>>, vector<8x128xf32>
      %c0_1 = arith.constant 0 : index
      %c0_2 = arith.constant 0 : index
      %5 = vector.load %arg7[%c0_1, %c0_2] : memref<1x128xf32, #tpu.memory_space<vmem>>, vector<1x128xf32>
      %6 = vector.shape_cast %5 : vector<1x128xf32> to vector<1x128xf32>
      %7 = vector.broadcast %6 : vector<1x128xf32> to vector<8x128xf32>
      %c0_3 = arith.constant 0 : index
      %c0_4 = arith.constant 0 : index
      %8 = vector.load %arg4[%c0_3, %c0_4] : memref<16x128xf32, #tpu.memory_space<vmem>>, vector<1x128xf32>
      %c0_5 = arith.constant 0 : index
      %c0_6 = arith.constant 0 : index
      %9 = vector.load %arg5[%c0_5, %c0_6] : memref<16x128xf32, #tpu.memory_space<vmem>>, vector<1x128xf32>
      %c0_7 = arith.constant 0 : index
      %c0_8 = arith.constant 0 : index
      %10 = vector.load %arg6[%c0_7, %c0_8] : memref<16x128xf32, #tpu.memory_space<vmem>>, vector<1x128xf32>
      %11 = vector.broadcast %8 : vector<1x128xf32> to vector<8x128xf32>
      %12 = arith.mulf %4, %11 : vector<8x128xf32>
      %13 = vector.broadcast %9 : vector<1x128xf32> to vector<8x128xf32>
      %14 = arith.addf %12, %13 : vector<8x128xf32>
      %cst = arith.constant 0.000000e+00 : f32
      %15 = vector.broadcast %cst : f32 to vector<8x128xf32>
      %16 = arith.maximumf %14, %15 : vector<8x128xf32>
      %17 = vector.broadcast %10 : vector<1x128xf32> to vector<8x128xf32>
      %18 = arith.mulf %16, %17 : vector<8x128xf32>
      %19 = arith.addf %7, %18 : vector<8x128xf32>
      %c1 = arith.constant 1 : index
      %c0_9 = arith.constant 0 : index
      %20 = vector.load %arg4[%c1, %c0_9] : memref<16x128xf32, #tpu.memory_space<vmem>>, vector<1x128xf32>
      %c1_10 = arith.constant 1 : index
      %c0_11 = arith.constant 0 : index
      %21 = vector.load %arg5[%c1_10, %c0_11] : memref<16x128xf32, #tpu.memory_space<vmem>>, vector<1x128xf32>
      %c1_12 = arith.constant 1 : index
      %c0_13 = arith.constant 0 : index
      %22 = vector.load %arg6[%c1_12, %c0_13] : memref<16x128xf32, #tpu.memory_space<vmem>>, vector<1x128xf32>
      %23 = vector.broadcast %20 : vector<1x128xf32> to vector<8x128xf32>
      %24 = arith.mulf %4, %23 : vector<8x128xf32>
      %25 = vector.broadcast %21 : vector<1x128xf32> to vector<8x128xf32>
      %26 = arith.addf %24, %25 : vector<8x128xf32>
      %cst_14 = arith.constant 0.000000e+00 : f32
      %27 = vector.broadcast %cst_14 : f32 to vector<8x128xf32>
      %28 = arith.maximumf %26, %27 : vector<8x128xf32>
      %29 = vector.broadcast %22 : vector<1x128xf32> to vector<8x128xf32>
      %30 = arith.mulf %28, %29 : vector<8x128xf32>
      %31 = arith.addf %19, %30 : vector<8x128xf32>
      %c2 = arith.constant 2 : index
      %c0_15 = arith.constant 0 : index
      %32 = vector.load %arg4[%c2, %c0_15] : memref<16x128xf32, #tpu.memory_space<vmem>>, vector<1x128xf32>
      %c2_16 = arith.constant 2 : index
      %c0_17 = arith.constant 0 : index
      %33 = vector.load %arg5[%c2_16, %c0_17] : memref<16x128xf32, #tpu.memory_space<vmem>>, vector<1x128xf32>
      %c2_18 = arith.constant 2 : index
      %c0_19 = arith.constant 0 : index
      %34 = vector.load %arg6[%c2_18, %c0_19] : memref<16x128xf32, #tpu.memory_space<vmem>>, vector<1x128xf32>
      %35 = vector.broadcast %32 : vector<1x128xf32> to vector<8x128xf32>
      %36 = arith.mulf %4, %35 : vector<8x128xf32>
      %37 = vector.broadcast %33 : vector<1x128xf32> to vector<8x128xf32>
      %38 = arith.addf %36, %37 : vector<8x128xf32>
      %cst_20 = arith.constant 0.000000e+00 : f32
      %39 = vector.broadcast %cst_20 : f32 to vector<8x128xf32>
      %40 = arith.maximumf %38, %39 : vector<8x128xf32>
      %41 = vector.broadcast %34 : vector<1x128xf32> to vector<8x128xf32>
      %42 = arith.mulf %40, %41 : vector<8x128xf32>
      %43 = arith.addf %31, %42 : vector<8x128xf32>
      %c3 = arith.constant 3 : index
      %c0_21 = arith.constant 0 : index
      %44 = vector.load %arg4[%c3, %c0_21] : memref<16x128xf32, #tpu.memory_space<vmem>>, vector<1x128xf32>
      %c3_22 = arith.constant 3 : index
      %c0_23 = arith.constant 0 : index
      %45 = vector.load %arg5[%c3_22, %c0_23] : memref<16x128xf32, #tpu.memory_space<vmem>>, vector<1x128xf32>
      %c3_24 = arith.constant 3 : index
      %c0_25 = arith.constant 0 : index
      %46 = vector.load %arg6[%c3_24, %c0_25] : memref<16x128xf32, #tpu.memory_space<vmem>>, vector<1x128xf32>
      %47 = vector.broadcast %44 : vector<1x128xf32> to vector<8x128xf32>
      %48 = arith.mulf %4, %47 : vector<8x128xf32>
      %49 = vector.broadcast %45 : vector<1x128xf32> to vector<8x128xf32>
      %50 = arith.addf %48, %49 : vector<8x128xf32>
      %cst_26 = arith.constant 0.000000e+00 : f32
      %51 = vector.broadcast %cst_26 : f32 to vector<8x128xf32>
      %52 = arith.maximumf %50, %51 : vector<8x128xf32>
      %53 = vector.broadcast %46 : vector<1x128xf32> to vector<8x128xf32>
      %54 = arith.mulf %52, %53 : vector<8x128xf32>
      %55 = arith.addf %43, %54 : vector<8x128xf32>
      %c4 = arith.constant 4 : index
      %c0_27 = arith.constant 0 : index
      %56 = vector.load %arg4[%c4, %c0_27] : memref<16x128xf32, #tpu.memory_space<vmem>>, vector<1x128xf32>
      %c4_28 = arith.constant 4 : index
      %c0_29 = arith.constant 0 : index
      %57 = vector.load %arg5[%c4_28, %c0_29] : memref<16x128xf32, #tpu.memory_space<vmem>>, vector<1x128xf32>
      %c4_30 = arith.constant 4 : index
      %c0_31 = arith.constant 0 : index
      %58 = vector.load %arg6[%c4_30, %c0_31] : memref<16x128xf32, #tpu.memory_space<vmem>>, vector<1x128xf32>
      %59 = vector.broadcast %56 : vector<1x128xf32> to vector<8x128xf32>
      %60 = arith.mulf %4, %59 : vector<8x128xf32>
      %61 = vector.broadcast %57 : vector<1x128xf32> to vector<8x128xf32>
      %62 = arith.addf %60, %61 : vector<8x128xf32>
      %cst_32 = arith.constant 0.000000e+00 : f32
      %63 = vector.broadcast %cst_32 : f32 to vector<8x128xf32>
      %64 = arith.maximumf %62, %63 : vector<8x128xf32>
      %65 = vector.broadcast %58 : vector<1x128xf32> to vector<8x128xf32>
      %66 = arith.mulf %64, %65 : vector<8x128xf32>
      %67 = arith.addf %55, %66 : vector<8x128xf32>
      %c5 = arith.constant 5 : index
      %c0_33 = arith.constant 0 : index
      %68 = vector.load %arg4[%c5, %c0_33] : memref<16x128xf32, #tpu.memory_space<vmem>>, vector<1x128xf32>
      %c5_34 = arith.constant 5 : index
      %c0_35 = arith.constant 0 : index
      %69 = vector.load %arg5[%c5_34, %c0_35] : memref<16x128xf32, #tpu.memory_space<vmem>>, vector<1x128xf32>
      %c5_36 = arith.constant 5 : index
      %c0_37 = arith.constant 0 : index
      %70 = vector.load %arg6[%c5_36, %c0_37] : memref<16x128xf32, #tpu.memory_space<vmem>>, vector<1x128xf32>
      %71 = vector.broadcast %68 : vector<1x128xf32> to vector<8x128xf32>
      %72 = arith.mulf %4, %71 : vector<8x128xf32>
      %73 = vector.broadcast %69 : vector<1x128xf32> to vector<8x128xf32>
      %74 = arith.addf %72, %73 : vector<8x128xf32>
      %cst_38 = arith.constant 0.000000e+00 : f32
      %75 = vector.broadcast %cst_38 : f32 to vector<8x128xf32>
      %76 = arith.maximumf %74, %75 : vector<8x128xf32>
      %77 = vector.broadcast %70 : vector<1x128xf32> to vector<8x128xf32>
      %78 = arith.mulf %76, %77 : vector<8x128xf32>
      %79 = arith.addf %67, %78 : vector<8x128xf32>
      %c6 = arith.constant 6 : index
      %c0_39 = arith.constant 0 : index
      %80 = vector.load %arg4[%c6, %c0_39] : memref<16x128xf32, #tpu.memory_space<vmem>>, vector<1x128xf32>
      %c6_40 = arith.constant 6 : index
      %c0_41 = arith.constant 0 : index
      %81 = vector.load %arg5[%c6_40, %c0_41] : memref<16x128xf32, #tpu.memory_space<vmem>>, vector<1x128xf32>
      %c6_42 = arith.constant 6 : index
      %c0_43 = arith.constant 0 : index
      %82 = vector.load %arg6[%c6_42, %c0_43] : memref<16x128xf32, #tpu.memory_space<vmem>>, vector<1x128xf32>
      %83 = vector.broadcast %80 : vector<1x128xf32> to vector<8x128xf32>
      %84 = arith.mulf %4, %83 : vector<8x128xf32>
      %85 = vector.broadcast %81 : vector<1x128xf32> to vector<8x128xf32>
      %86 = arith.addf %84, %85 : vector<8x128xf32>
      %cst_44 = arith.constant 0.000000e+00 : f32
      %87 = vector.broadcast %cst_44 : f32 to vector<8x128xf32>
      %88 = arith.maximumf %86, %87 : vector<8x128xf32>
      %89 = vector.broadcast %82 : vector<1x128xf32> to vector<8x128xf32>
      %90 = arith.mulf %88, %89 : vector<8x128xf32>
      %91 = arith.addf %79, %90 : vector<8x128xf32>
      %c7 = arith.constant 7 : index
      %c0_45 = arith.constant 0 : index
      %92 = vector.load %arg4[%c7, %c0_45] : memref<16x128xf32, #tpu.memory_space<vmem>>, vector<1x128xf32>
      %c7_46 = arith.constant 7 : index
      %c0_47 = arith.constant 0 : index
      %93 = vector.load %arg5[%c7_46, %c0_47] : memref<16x128xf32, #tpu.memory_space<vmem>>, vector<1x128xf32>
      %c7_48 = arith.constant 7 : index
      %c0_49 = arith.constant 0 : index
      %94 = vector.load %arg6[%c7_48, %c0_49] : memref<16x128xf32, #tpu.memory_space<vmem>>, vector<1x128xf32>
      %95 = vector.broadcast %92 : vector<1x128xf32> to vector<8x128xf32>
      %96 = arith.mulf %4, %95 : vector<8x128xf32>
      %97 = vector.broadcast %93 : vector<1x128xf32> to vector<8x128xf32>
      %98 = arith.addf %96, %97 : vector<8x128xf32>
      %cst_50 = arith.constant 0.000000e+00 : f32
      %99 = vector.broadcast %cst_50 : f32 to vector<8x128xf32>
      %100 = arith.maximumf %98, %99 : vector<8x128xf32>
      %101 = vector.broadcast %94 : vector<1x128xf32> to vector<8x128xf32>
      %102 = arith.mulf %100, %101 : vector<8x128xf32>
      %103 = arith.addf %91, %102 : vector<8x128xf32>
      %c8 = arith.constant 8 : index
      %c0_51 = arith.constant 0 : index
      %104 = vector.load %arg4[%c8, %c0_51] : memref<16x128xf32, #tpu.memory_space<vmem>>, vector<1x128xf32>
      %c8_52 = arith.constant 8 : index
      %c0_53 = arith.constant 0 : index
      %105 = vector.load %arg5[%c8_52, %c0_53] : memref<16x128xf32, #tpu.memory_space<vmem>>, vector<1x128xf32>
      %c8_54 = arith.constant 8 : index
      %c0_55 = arith.constant 0 : index
      %106 = vector.load %arg6[%c8_54, %c0_55] : memref<16x128xf32, #tpu.memory_space<vmem>>, vector<1x128xf32>
      %107 = vector.broadcast %104 : vector<1x128xf32> to vector<8x128xf32>
      %108 = arith.mulf %4, %107 : vector<8x128xf32>
      %109 = vector.broadcast %105 : vector<1x128xf32> to vector<8x128xf32>
      %110 = arith.addf %108, %109 : vector<8x128xf32>
      %cst_56 = arith.constant 0.000000e+00 : f32
      %111 = vector.broadcast %cst_56 : f32 to vector<8x128xf32>
      %112 = arith.maximumf %110, %111 : vector<8x128xf32>
      %113 = vector.broadcast %106 : vector<1x128xf32> to vector<8x128xf32>
      %114 = arith.mulf %112, %113 : vector<8x128xf32>
      %115 = arith.addf %103, %114 : vector<8x128xf32>
      %c9 = arith.constant 9 : index
      %c0_57 = arith.constant 0 : index
      %116 = vector.load %arg4[%c9, %c0_57] : memref<16x128xf32, #tpu.memory_space<vmem>>, vector<1x128xf32>
      %c9_58 = arith.constant 9 : index
      %c0_59 = arith.constant 0 : index
      %117 = vector.load %arg5[%c9_58, %c0_59] : memref<16x128xf32, #tpu.memory_space<vmem>>, vector<1x128xf32>
      %c9_60 = arith.constant 9 : index
      %c0_61 = arith.constant 0 : index
      %118 = vector.load %arg6[%c9_60, %c0_61] : memref<16x128xf32, #tpu.memory_space<vmem>>, vector<1x128xf32>
      %119 = vector.broadcast %116 : vector<1x128xf32> to vector<8x128xf32>
      %120 = arith.mulf %4, %119 : vector<8x128xf32>
      %121 = vector.broadcast %117 : vector<1x128xf32> to vector<8x128xf32>
      %122 = arith.addf %120, %121 : vector<8x128xf32>
      %cst_62 = arith.constant 0.000000e+00 : f32
      %123 = vector.broadcast %cst_62 : f32 to vector<8x128xf32>
      %124 = arith.maximumf %122, %123 : vector<8x128xf32>
      %125 = vector.broadcast %118 : vector<1x128xf32> to vector<8x128xf32>
      %126 = arith.mulf %124, %125 : vector<8x128xf32>
      %127 = arith.addf %115, %126 : vector<8x128xf32>
      %c10 = arith.constant 10 : index
      %c0_63 = arith.constant 0 : index
      %128 = vector.load %arg4[%c10, %c0_63] : memref<16x128xf32, #tpu.memory_space<vmem>>, vector<1x128xf32>
      %c10_64 = arith.constant 10 : index
      %c0_65 = arith.constant 0 : index
      %129 = vector.load %arg5[%c10_64, %c0_65] : memref<16x128xf32, #tpu.memory_space<vmem>>, vector<1x128xf32>
      %c10_66 = arith.constant 10 : index
      %c0_67 = arith.constant 0 : index
      %130 = vector.load %arg6[%c10_66, %c0_67] : memref<16x128xf32, #tpu.memory_space<vmem>>, vector<1x128xf32>
      %131 = vector.broadcast %128 : vector<1x128xf32> to vector<8x128xf32>
      %132 = arith.mulf %4, %131 : vector<8x128xf32>
      %133 = vector.broadcast %129 : vector<1x128xf32> to vector<8x128xf32>
      %134 = arith.addf %132, %133 : vector<8x128xf32>
      %cst_68 = arith.constant 0.000000e+00 : f32
      %135 = vector.broadcast %cst_68 : f32 to vector<8x128xf32>
      %136 = arith.maximumf %134, %135 : vector<8x128xf32>
      %137 = vector.broadcast %130 : vector<1x128xf32> to vector<8x128xf32>
      %138 = arith.mulf %136, %137 : vector<8x128xf32>
      %139 = arith.addf %127, %138 : vector<8x128xf32>
      %c11 = arith.constant 11 : index
      %c0_69 = arith.constant 0 : index
      %140 = vector.load %arg4[%c11, %c0_69] : memref<16x128xf32, #tpu.memory_space<vmem>>, vector<1x128xf32>
      %c11_70 = arith.constant 11 : index
      %c0_71 = arith.constant 0 : index
      %141 = vector.load %arg5[%c11_70, %c0_71] : memref<16x128xf32, #tpu.memory_space<vmem>>, vector<1x128xf32>
      %c11_72 = arith.constant 11 : index
      %c0_73 = arith.constant 0 : index
      %142 = vector.load %arg6[%c11_72, %c0_73] : memref<16x128xf32, #tpu.memory_space<vmem>>, vector<1x128xf32>
      %143 = vector.broadcast %140 : vector<1x128xf32> to vector<8x128xf32>
      %144 = arith.mulf %4, %143 : vector<8x128xf32>
      %145 = vector.broadcast %141 : vector<1x128xf32> to vector<8x128xf32>
      %146 = arith.addf %144, %145 : vector<8x128xf32>
      %cst_74 = arith.constant 0.000000e+00 : f32
      %147 = vector.broadcast %cst_74 : f32 to vector<8x128xf32>
      %148 = arith.maximumf %146, %147 : vector<8x128xf32>
      %149 = vector.broadcast %142 : vector<1x128xf32> to vector<8x128xf32>
      %150 = arith.mulf %148, %149 : vector<8x128xf32>
      %151 = arith.addf %139, %150 : vector<8x128xf32>
      %c12 = arith.constant 12 : index
      %c0_75 = arith.constant 0 : index
      %152 = vector.load %arg4[%c12, %c0_75] : memref<16x128xf32, #tpu.memory_space<vmem>>, vector<1x128xf32>
      %c12_76 = arith.constant 12 : index
      %c0_77 = arith.constant 0 : index
      %153 = vector.load %arg5[%c12_76, %c0_77] : memref<16x128xf32, #tpu.memory_space<vmem>>, vector<1x128xf32>
      %c12_78 = arith.constant 12 : index
      %c0_79 = arith.constant 0 : index
      %154 = vector.load %arg6[%c12_78, %c0_79] : memref<16x128xf32, #tpu.memory_space<vmem>>, vector<1x128xf32>
      %155 = vector.broadcast %152 : vector<1x128xf32> to vector<8x128xf32>
      %156 = arith.mulf %4, %155 : vector<8x128xf32>
      %157 = vector.broadcast %153 : vector<1x128xf32> to vector<8x128xf32>
      %158 = arith.addf %156, %157 : vector<8x128xf32>
      %cst_80 = arith.constant 0.000000e+00 : f32
      %159 = vector.broadcast %cst_80 : f32 to vector<8x128xf32>
      %160 = arith.maximumf %158, %159 : vector<8x128xf32>
      %161 = vector.broadcast %154 : vector<1x128xf32> to vector<8x128xf32>
      %162 = arith.mulf %160, %161 : vector<8x128xf32>
      %163 = arith.addf %151, %162 : vector<8x128xf32>
      %c13 = arith.constant 13 : index
      %c0_81 = arith.constant 0 : index
      %164 = vector.load %arg4[%c13, %c0_81] : memref<16x128xf32, #tpu.memory_space<vmem>>, vector<1x128xf32>
      %c13_82 = arith.constant 13 : index
      %c0_83 = arith.constant 0 : index
      %165 = vector.load %arg5[%c13_82, %c0_83] : memref<16x128xf32, #tpu.memory_space<vmem>>, vector<1x128xf32>
      %c13_84 = arith.constant 13 : index
      %c0_85 = arith.constant 0 : index
      %166 = vector.load %arg6[%c13_84, %c0_85] : memref<16x128xf32, #tpu.memory_space<vmem>>, vector<1x128xf32>
      %167 = vector.broadcast %164 : vector<1x128xf32> to vector<8x128xf32>
      %168 = arith.mulf %4, %167 : vector<8x128xf32>
      %169 = vector.broadcast %165 : vector<1x128xf32> to vector<8x128xf32>
      %170 = arith.addf %168, %169 : vector<8x128xf32>
      %cst_86 = arith.constant 0.000000e+00 : f32
      %171 = vector.broadcast %cst_86 : f32 to vector<8x128xf32>
      %172 = arith.maximumf %170, %171 : vector<8x128xf32>
      %173 = vector.broadcast %166 : vector<1x128xf32> to vector<8x128xf32>
      %174 = arith.mulf %172, %173 : vector<8x128xf32>
      %175 = arith.addf %163, %174 : vector<8x128xf32>
      %c14 = arith.constant 14 : index
      %c0_87 = arith.constant 0 : index
      %176 = vector.load %arg4[%c14, %c0_87] : memref<16x128xf32, #tpu.memory_space<vmem>>, vector<1x128xf32>
      %c14_88 = arith.constant 14 : index
      %c0_89 = arith.constant 0 : index
      %177 = vector.load %arg5[%c14_88, %c0_89] : memref<16x128xf32, #tpu.memory_space<vmem>>, vector<1x128xf32>
      %c14_90 = arith.constant 14 : index
      %c0_91 = arith.constant 0 : index
      %178 = vector.load %arg6[%c14_90, %c0_91] : memref<16x128xf32, #tpu.memory_space<vmem>>, vector<1x128xf32>
      %179 = vector.broadcast %176 : vector<1x128xf32> to vector<8x128xf32>
      %180 = arith.mulf %4, %179 : vector<8x128xf32>
      %181 = vector.broadcast %177 : vector<1x128xf32> to vector<8x128xf32>
      %182 = arith.addf %180, %181 : vector<8x128xf32>
      %cst_92 = arith.constant 0.000000e+00 : f32
      %183 = vector.broadcast %cst_92 : f32 to vector<8x128xf32>
      %184 = arith.maximumf %182, %183 : vector<8x128xf32>
      %185 = vector.broadcast %178 : vector<1x128xf32> to vector<8x128xf32>
      %186 = arith.mulf %184, %185 : vector<8x128xf32>
      %187 = arith.addf %175, %186 : vector<8x128xf32>
      %c15 = arith.constant 15 : index
      %c0_93 = arith.constant 0 : index
      %188 = vector.load %arg4[%c15, %c0_93] : memref<16x128xf32, #tpu.memory_space<vmem>>, vector<1x128xf32>
      %c15_94 = arith.constant 15 : index
      %c0_95 = arith.constant 0 : index
      %189 = vector.load %arg5[%c15_94, %c0_95] : memref<16x128xf32, #tpu.memory_space<vmem>>, vector<1x128xf32>
      %c15_96 = arith.constant 15 : index
      %c0_97 = arith.constant 0 : index
      %190 = vector.load %arg6[%c15_96, %c0_97] : memref<16x128xf32, #tpu.memory_space<vmem>>, vector<1x128xf32>
      %191 = vector.broadcast %188 : vector<1x128xf32> to vector<8x128xf32>
      %192 = arith.mulf %4, %191 : vector<8x128xf32>
      %193 = vector.broadcast %189 : vector<1x128xf32> to vector<8x128xf32>
      %194 = arith.addf %192, %193 : vector<8x128xf32>
      %cst_98 = arith.constant 0.000000e+00 : f32
      %195 = vector.broadcast %cst_98 : f32 to vector<8x128xf32>
      %196 = arith.maximumf %194, %195 : vector<8x128xf32>
      %197 = vector.broadcast %190 : vector<1x128xf32> to vector<8x128xf32>
      %198 = arith.mulf %196, %197 : vector<8x128xf32>
      %199 = arith.addf %187, %198 : vector<8x128xf32>
      %cst_99 = arith.constant 0.000000e+00 : f32
      %200 = vector.broadcast %cst_99 : f32 to vector<8x128xf32>
      %201 = arith.maximumf %199, %200 : vector<8x128xf32>
      %c0_100 = arith.constant 0 : index
      %202 = arith.index_cast %2 : i32 to index
      %c0_101 = arith.constant 0 : index
      %203 = vector.load %arg8[%c0_100, %202, %c0_101] : memref<1x16x128xf32, #tpu.memory_space<vmem>>, vector<1x8x128xf32>
      %204 = vector.shape_cast %203 : vector<1x8x128xf32> to vector<8x128xf32>
      %205 = vector.shape_cast %201 : vector<8x128xf32> to vector<1x8x128xf32>
      tpu.vector_store %arg8[%c0_100, %202, %c0_101], %205 {strides = array<i32>} : memref<1x16x128xf32, #tpu.memory_space<vmem>>, vector<1x8x128xf32>,
    }
    %c2_i32_0 = arith.constant 2 : i32
    return
  }
  func.func @transform_0(%arg0: i32, %arg1: i32, %arg2: i32) -> (i32, i32) {
    %c2_i32 = arith.constant 2 : i32
    %0 = arith.muli %arg0, %c2_i32 : i32
    %1 = arith.addi %0, %arg1 : i32
    %c0_i32 = arith.constant 0 : i32
    return %arg2, %1 : i32, i32
  }
  func.func @transform_1(%arg0: i32, %arg1: i32, %arg2: i32) -> (i32, i32) {
    %c2_i32 = arith.constant 2 : i32
    %0 = arith.muli %arg0, %c2_i32 : i32
    %1 = arith.addi %0, %arg1 : i32
    %c0_i32 = arith.constant 0 : i32
    %c0_i32_0 = arith.constant 0 : i32
    return %c0_i32, %1 : i32, i32
  }
  func.func @transform_2(%arg0: i32, %arg1: i32, %arg2: i32) -> (i32, i32) {
    %c2_i32 = arith.constant 2 : i32
    %0 = arith.muli %arg0, %c2_i32 : i32
    %1 = arith.addi %0, %arg1 : i32
    %c0_i32 = arith.constant 0 : i32
    %c0_i32_0 = arith.constant 0 : i32
    return %c0_i32, %1 : i32, i32
  }
  func.func @transform_3(%arg0: i32, %arg1: i32, %arg2: i32) -> (i32, i32) {
    %c2_i32 = arith.constant 2 : i32
    %0 = arith.muli %arg0, %c2_i32 : i32
    %1 = arith.addi %0, %arg1 : i32
    %c0_i32 = arith.constant 0 : i32
    %c0_i32_0 = arith.constant 0 : i32
    return %c0_i32, %1 : i32, i32
  }
  func.func @transform_4(%arg0: i32, %arg1: i32, %arg2: i32) -> (i32, i32) {
    %c2_i32 = arith.constant 2 : i32
    %0 = arith.muli %arg0, %c2_i32 : i32
    %1 = arith.addi %0, %arg1 : i32
    %c0_i32 = arith.constant 0 : i32
    %c0_i32_0 = arith.constant 0 : i32
    return %c0_i32, %1 : i32, i32
  }
  func.func @transform_5(%arg0: i32, %arg1: i32, %arg2: i32) -> (i32, i32, i32) {
    %c0_i32 = arith.constant 0 : i32
    return %arg0, %arg2, %arg1 : i32, i32, i32
  }
}

</mosaic_0001>

<bundles_post_ra>
// kernel: tpu_custom_call.1
= control target key start
LH: loop header
LB: loop body
LE: loop exit
PB: predicated region body
PF: predicated region fallthrough
CT: control target
= control target key end

     0   :  { %s2163_s0 = inlined_call_operand.hbm [shape: f32[20,512], index: 0, kind: input, shape index: {}]   ;;  %s2164_s1 = inlined_call_operand.hbm [shape: f32[16,512], index: 1, kind: input, shape index: {}]   ;;  %s2165_s2 = inlined_call_operand.hbm [shape: f32[16,512], index: 2, kind: input, shape index: {}]   ;;  %s2166_s3 = inlined_call_operand.hbm [shape: f32[16,512], index: 3, kind: input, shape index: {}]   ;;  %s2167_s4 = inlined_call_operand.hbm [shape: f32[1,512], index: 4, kind: input, shape index: {}]   ;;  %s2168_s5 = inlined_call_operand.vmem [shape: f32[2,20,256], index: 5, kind: output, shape index: {}]  }
   0x1   :  { %2184 = sst [smem:[#allocation32_spill]] %s2163_s0 }
   0x2   :  { %2185 = sst [smem:[#allocation33_spill]] %s2164_s1 }
   0x3   :  { %2186 = sst [smem:[#allocation34_spill]] %s2165_s2 }
   0x4   :  { %2187 = sst [smem:[#allocation35_spill]] %s2166_s3 }
   0x5   :  { %2188 = sst [smem:[#allocation36_spill]] %s2167_s4 }
   0x6   :  { %2189 = sst [smem:[#allocation37_spill]] %s2168_s5 }
   0x7   :  { %10 = vsyncpa [#allocation3], 0 }
   0x8   :  { %12 = vsyncpa [#allocation3 + $0x1], 0 }
   0x9   :  { %13 = vsyncpa [#allocation5], 0 }
   0xa   :  { %15 = vsyncpa [#allocation5 + $0x1], 0 }
   0xb   :  { %16 = vsyncpa [#allocation8], 0 }
   0xc   :  { %18 = vsyncpa [#allocation8 + $0x1], 0  ;;  %s1739_s18 = smov 0   ;;  %s1741_s19 = smov 0  }
   0xd   :  { %s1743_s20 = smov 0   ;;  %s1745_s21 = smov 0  }
   0xe   :  { %s1747_s22 = smov 0   ;;  %s1749_s23 = smov 0  }
   0xf   :  { %s1751_s24 = smov 0   ;;  %s1753_s25 = smov 0  }
  0x10   :  { %s1755_s26 = smov 0   ;;  %s1757_s27 = smov 0  }
  0x11   :  { %s1759_s28 = smov 0   ;;  %s1761_s29 = smov 0  }
  0x12   :  { %s1763_s30 = smov 0   ;;  %s1765_s6 = smov 0  }
  0x13   :  { %s1767_s7 = smov 0  }
  0x14 LB: > { %2190 = sst [smem:[#allocation14_spill]] %s1608_s18  ;;  %s1815_s8 = sadd.s32 4294967295, %s1664_s7   ;;  %s1664_s7 = sphi %s1767_s7, %s24_s7   ;;  %s1660_s6 = sphi %s1765_s6, %s2240_s6   ;;  %s1656_s30 = sphi %s1763_s30, %s2239_s30   ;;  %s1652_s29 = sphi %s1761_s29, %s2238_s29   ;;  %s1648_s28 = sphi %s1759_s28, %s2237_s28   ;;  %s1644_s27 = sphi %s1757_s27, %s2236_s27   ;;  %s1640_s26 = sphi %s1755_s26, %s2235_s26   ;;  %s1636_s25 = sphi %s1753_s25, %s2234_s25   ;;  %s1632_s24 = sphi %s1751_s24, %s2233_s24   ;;  %s1628_s23 = sphi %s1749_s23, %s2232_s23   ;;  %s1624_s22 = sphi %s1747_s22, %s2243_s22   ;;  %s1620_s21 = sphi %s1745_s21, %s2242_s21   ;;  %s1616_s20 = sphi %s1743_s20, %s2241_s20   ;;  %s1612_s19 = sphi %s1741_s19, %s2230_s19   ;;  %s1608_s18 = sphi %s1739_s18, %s2229_s18  }
  0x15   : > { %2191 = sst [smem:[#allocation15_spill]] %s1612_s19  ;;  %s36_s9 = sadd.s32 1, %s1652_s29 }
  0x16   : > { %2192 = sst [smem:[#allocation16_spill]] %s1632_s24  ;;  %p37_p0 = scmp.ge.s32.totalorder %s36_s9, 2 }
  0x17   : > { %2193 = sst [smem:[#allocation17_spill]] %s1636_s25  ;;  %s39_s10 = sadd.s32 1, %s1656_s30 }
  0x18   : > { %2194 = sst [smem:[#allocation18_spill]] %s1640_s26  ;;  %s43_s11 = sadd.s32 1, %s1660_s6 }
  0x19   : > { %2195 = sst [smem:[#allocation19_spill]] %s1644_s27  ;;  %s1030_s12 = sshll.u32 %s1660_s6, 1 }
  0x1a   : > { %2196 = sst [smem:[#allocation20_spill]] %s1648_s28  ;;  %s2245_s9 = smov (%p37_p0, %s36_s9), 0 }
  0x1b   : > { %2197 = sst [smem:[#allocation21_spill]] %s1652_s29  ;;  %s2247_s10 = smov (!%p37_p0, %s39_s10), %s1656_s30 }
  0x1c   : > { %2198 = sst [smem:[#allocation22_spill]] %s1656_s30  ;;  %s1825_s13 = sadd.s32 %s1656_s30, %s1030_s12 }
  0x1d   : > { %2199 = sst [smem:[#allocation23_spill]] %s1660_s6  ;;  %s51_s14 = ssub.s32 %s1652_s29, %s2245_s9 }
  0x1e   : > { %2200 = sst [smem:[#allocation24_spill]] %s2245_s9  ;;  %p41_p1 = scmp.ge.s32.totalorder %s2247_s10, 2 }
  0x1f   : > { %s56_s15 = sadd.s32 1, %s1636_s25  ;;  %p63_p2 = scmp.ne.s32.totalorder %s1636_s25, %s1632_s24 }
  0x20   : > { %p64_p3 = scmp.eq.s32.totalorder %s1664_s7, 0  ;;  %s2249_s10 = smov (%p41_p1, %s2247_s10), 0 }
  0x21   : > { %2201 = sst [smem:[#allocation25_spill]] %s2249_s10  ;;  %s2251_s11 = smov (!%p41_p1, %s43_s11), %s1660_s6 }
  0x22   : > { %p1836_p4 = por %p64_p3, %p63_p2  ;;  %p69_p5 = scmp.ne.s32.totalorder %s1632_s24, %s1628_s23 }
  0x23   : > { %p45_p6 = scmp.ge.s32.totalorder %s2251_s11, 2  ;;  %p70_p7 = scmp.eq.s32.totalorder %s1815_s8, 0 }
  0x24   : > { %s86_s17 = sadd.s32 1, %s1624_s22  ;;  %p93_p8 = scmp.ne.s32.totalorder %s1624_s22, %s1620_s21 }
  0x25   : > { %s2253_s11 = smov (%p45_p6, %s2251_s11), 0  ;;  %p1848_p9 = por %p70_p7, %p69_p5 }
  0x26   : > { %2203 = sst [smem:[#allocation26_spill]] %s2253_s11  ;;  %p1852_p10 = por %p93_p8, %p64_p3 }
  0x27   : > { %s2204_s12 = scalar_select %p1848_p9, 1, 0 }
  0x28   : > { %s1031_s23 = sshll.u32 %s2253_s11, 1  ;;  %p99_p11 = scmp.ne.s32.totalorder %s1620_s21, %s1616_s20 }
  0x29   : > { %2205 = sst [smem:[#allocation27_spill]] %s2204_s12  ;;  %s50_s5 = sadd.s32 %s1031_s23, %s2249_s10 }
  0x2a   : > { %s199_s28 = ssub.s32 %s1660_s6, %s2253_s11  ;;  %s52_s27 = ssub.s32 %s1825_s13, %s50_s5 }
  0x2b   : > { %p1863_p12 = por %p99_p11, %p70_p7  ;;  %s53_s24 = sor.u32 %s52_s27, %s51_s14 }
  0x2c   : > { %p84_p13 = scmp.eq.s32.totalorder %s52_s27, 0  ;;  %p54_p0 = scmp.eq.s32.totalorder %s53_s24, 0 }
  0x2d   : > { %s201_s12 = sor.u32 %s199_s28, %s51_s14  ;;  %s202_s3 = ssub.s32 %s1656_s30, %s2249_s10 }
  0x2e   : > { %s1868_s4 = scalar_select %p84_p13, %s1624_s22, %s86_s17  }
  0x2f   : > { %s1871_s2 = scalar_select %p54_p0, %s1636_s25, %s56_s15  }
  0x30   : > { %2208 = sst [smem:[#allocation28_spill]] %s1868_s4  ;;  %s206_s1 = sadd.s32 1, %s1612_s19 }
  0x31   : > { %2209 = sst [smem:[#allocation29_spill]] %s1871_s2  ;;  %s203_s20 = sor.u32 %s202_s3, %s201_s12 }
  0x32   : > { %p216_p1 = scmp.ne.s32.totalorder %s1612_s19, %s1608_s18  ;;  %p204_p2 = scmp.eq.s32.totalorder %s203_s20, 0 }
  0x33   : > { %p217_p3 = scmp.eq.s32.totalorder %s1815_s8, 7  ;;  %p1041_p6 = scmp.ge.s32.totalorder %s1664_s7, 8 }
  0x34   : > { %s1880_s23 = scalar_select %p204_p2, %s1612_s19, %s206_s1  }
  0x35   : > { %p1882_p5 = por %p217_p3, %p216_p1  ;;  %239 = sbr.rel (%p1041_p6) target bundleno = 127 (0x7f), region = 16 }
  0x36   : > { %2210 = sst [smem:[#allocation30_spill]] %s1880_s23 }
  0x37   : > { %s2211_s5 = scalar_select %p1882_p5, 1, 0 }
  0x39   : > { %2212 = sst [smem:[#allocation31_spill]] %s2211_s5 }
  0x3a   : > { %242 = sbr.rel (!%p1836_p4) target bundleno = 102 (0x66), region = 20  ;;  %s243_s24 = sand.u32 (%p1836_p4), 1, %s1636_s25  }
  0x3b   : > { %s1044_s27 = sshll.u32 (%p1836_p4), %s1652_s29, 1  ;;  %s1042_s3 = sshll.u32 (%p1836_p4), %s243_s24, 4 }
  0x3c   : > { %s251_s28 = ssub.s32 (%p1836_p4), 3, %s1044_s27  ;;  %s1894_s17 = scalar_lea.sflag (%p1836_p4), [#allocation3], %s243_s24 }
  0x3d   : > { %p252_p7 = scmp.lt.s32.totalorder (%p1836_p4), %s251_s28, 2  ;;  %s247_s12 = scalar_lea.vmem (%p1836_p4), [#allocation2], %s1042_s3 }
  0x3f   : > { %s2255_s28 = smov (!%p252_p7, %s251_s28), 2 }
  0x40   : > { %s1045_s1 = sshll.u32 %s2255_s28, 3 }
  0x41   : > { %s255_s14 = ssub.s32 16, %s1045_s1 }
  0x42   : > { %s256_s15 = sshll.u32 %s255_s14, 4 }
  0x43   : > { %257 = vsyncadd %s1894_s17, %s256_s15  ;;  %p1897_p4 = scmp.ne.s32.totalorder %s1045_s1, 0  ;;  %s1086_s20 = sshll.u32 %s1652_s29, 3 }
  0x44   : > { %s260_s27 = sadd.s32 %s1086_s20, %s1825_s13  ;;  %s1903_s11 = sshll.u32 %s247_s12, 4  ;;  %s267_s11 = int_to_ptr.vmem [resolvable:$true] %s1903_s11 }
  0x45   : > { %s1048_s14 = sshll.u32 %s260_s27, 3  ;;  %s2214_s0 = sld [smem:[#allocation32_spill]] }
  0x46   : > { %s1050_s15 = sshll.u32 %s2255_s28, 7 }
  0x47   : > { %s1349_s30 = sshrl.u32 %s1050_s15, 4 }
  0x4b   : > { %s262_s3 = scalar_lea.hbm %s2214_s0, %s1048_s14  ;;  %s1358_s27 = scalar_lea.hbm %s2214_s0, 96 }
  0x4c   : > { %s264_s6 = sshll.u32 %s262_s3, 4  ;;  %s1910_s6 = int_to_ptr.hbm [resolvable:$true] %s264_s6 }
  0x4d   : > { %s1347_s1 = sshra.s32 %s1910_s6, 4  ;;  %s1348_s1 = int_to_ptr.hbm [resolvable:$true] %s1347_s1 }
  0x4e   : > { %s1354_s29 = scalar_lea.hbm %s1348_s1, %s1349_s30 }
  0x4f   : > { %p1355_p8 = scmp.ne.s32.totalorder %s1348_s1, %s1354_s29  ;;  %p1360_p0 = scmp.lt.s32.totalorder %s1358_s27, %s1354_s29 }
  0x51   : > { %p1356_p11 = pnand %p1355_p8, %p1897_p4 }
  0x53   : > { %p1357_p13 = pneg %p1356_p11 }
  0x55   : > { %p1362_p1 = pnand %p1360_p0, %p1357_p13 }
  0x57   : > { %1365 = shalt.err (!%p1362_p1)
}
  0x58   : > { %s1366_s10 = sshra.s32 %s267_s11, 4  ;;  %s1702_s24 = smov [#allocation2]   ;;  %s1367_s10 = int_to_ptr.vmem [resolvable:$true] %s1366_s10 }
  0x59   : > { %s1373_s14 = scalar_lea.vmem %s1367_s10, %s1349_s30  ;;  %s1377_s3 = scalar_lea.vmem %s1702_s24, 32 }
  0x5a   : > { %p1374_p2 = scmp.ne.s32.totalorder %s1367_s10, %s1373_s14  ;;  %p1379_p7 = scmp.lt.s32.totalorder %s1377_s3, %s1373_s14 }
  0x5c   : > { %p1375_p3 = pnand %p1374_p2, %p1897_p4 }
  0x5e   : > { %p1376_p6 = pneg %p1375_p3 }
  0x60   : > { %p1381_p8 = pnand %p1379_p7, %p1376_p6 }
  0x62   : > { %1384 = shalt.err (!%p1381_p8)
}
  0x63   : > { %s1703_s1 = smov 512   ;;  %s1704_s29 = smov 128  }
  0x64   : > { %s1705_s12 = smov 8  }
  0x65   : > { %272 = dma.hbm_to_vmem [thread:$0]  (%p1897_p4), %s1910_s6, %s1050_s15, %s267_s11, %s1894_s17, %s1703_s1, %s1704_s29, %s1705_s12  }
  0x66 PF: > { %s276_s30 = sand.u32 1, %s1664_s7   ;;  %s2179_s20 = sand.u32 1, %s1624_s22  }
  0x67   : > { %s1051_s27 = sshll.u32 %s2179_s20, 4  ;;  %s1053_s10 = sshll.u32 %s1825_s13, 3 }
  0x68   : > { %s2215_s3 = sld [smem:[#allocation33_spill]]  ;;  %s280_s2 = scalar_lea.vmem [#allocation4], %s1051_s27 }
  0x69   : > { %s289_s16 = sshll.u32 %s280_s2, 4  ;;  %s277_s6 = scalar_lea.sflag [#allocation5], %s276_s30  ;;  %s290_s16 = int_to_ptr.vmem [resolvable:$true] %s289_s16 }
  0x6a   : > { %s1706_s11 = smov 512   ;;  %s1707_s17 = smov 128  }
  0x6b   : > { %s1708_s15 = smov 8   ;;  %s2216_s12 = sld [smem:[#allocation35_spill]] }
  0x6c   : > { %s326_s14 = scalar_lea.vmem [#allocation7], %s1051_s27  ;;  %s2217_s4 = sld [smem:[#allocation34_spill]] }
  0x6d   : > { %s335_s24 = sshll.u32 %s326_s14, 4  ;;  %s2219_s14 = sand.u32 1, %s1624_s22   ;;  %s336_s24 = int_to_ptr.vmem [resolvable:$true] %s335_s24 }
  0x6e   : > { %s286_s0 = scalar_lea.hbm %s2215_s3, %s1053_s10  ;;  %s348_s5 = scalar_lea.vmem [#allocation9], %s2219_s14 }
  0x6f   : > { %s287_s28 = sshll.u32 %s286_s0, 4  ;;  %s323_s0 = scalar_lea.sflag [#allocation8], %s276_s30  ;;  %s288_s28 = int_to_ptr.hbm [resolvable:$true] %s287_s28 }
  0x70   : > { %1091 = dma.hbm_to_vmem [thread:$0]  (%p1852_p10), %s288_s28, 256, %s290_s16, %s277_s6, %s1706_s11, %s1707_s17, %s1708_s15  }
  0x71   : > { %s332_s20 = scalar_lea.hbm %s2216_s12, %s1053_s10  ;;  %s303_s16 = scalar_lea.vmem [#allocation6], %s1051_s27 }
  0x72   : > { %s333_s2 = sshll.u32 %s332_s20, 4  ;;  %s309_s23 = scalar_lea.hbm %s2217_s4, %s1053_s10  ;;  %s334_s2 = int_to_ptr.hbm [resolvable:$true] %s333_s2 }
  0x73   : > { %1093 = dma.hbm_to_vmem [thread:$0]  (%p1852_p10), %s334_s2, 256, %s336_s24, %s323_s0, %s1706_s11, %s1707_s17, %s1708_s15  }
  0x74   : > { %s312_s28 = sshll.u32 %s303_s16, 4  ;;  %s310_s19 = sshll.u32 %s309_s23, 4  ;;  %s313_s28 = int_to_ptr.vmem [resolvable:$true] %s312_s28  ;;  %s311_s19 = int_to_ptr.hbm [resolvable:$true] %s310_s19 }
  0x75   : > { %1092 = dma.hbm_to_vmem [thread:$0]  (%p1852_p10), %s311_s19, 256, %s313_s28, %s277_s6, %s1706_s11, %s1707_s17, %s1708_s15  }
  0x76   : > { %s2218_s20 = sld [smem:[#allocation36_spill]]  ;;  %s357_s30 = sshll.u32 %s348_s5, 4  ;;  %s358_s30 = int_to_ptr.vmem [resolvable:$true] %s357_s30 }
  0x7c   : > { %s353_s12 = scalar_lea.hbm %s2218_s20, %s1825_s13 }
  0x7d   : > { %s355_s18 = sshll.u32 %s353_s12, 4  ;;  %s356_s18 = int_to_ptr.hbm [resolvable:$true] %s355_s18 }
  0x7e   : > { %1094 = dma.hbm_to_vmem [thread:$0]  (%p1852_p10), %s356_s18, 16, %s358_s30, %s323_s0  }
  0x7f PF: > { %p1061_p4 = scmp.ge.s32.totalorder %s1664_s7, 1  ;;  %p362_p11 = scmp.lt.s32.totalorder %s1664_s7, 9 }
  0x81   : > { %p363_p13 = pnand %p1061_p4, %p362_p11 }
  0x82   : > { %s2220_s4 = sld [smem:[#allocation16_spill]] (!%p363_p13) }
  0x83   : > { %366 = sbr.rel (%p363_p13) target bundleno = 251 (0xfb), region = 40 }
  0x88   : > { %s368_s25 = sand.u32 1, %s2220_s4  }
  0x89   : > { %s1963_s23 = sshll.u32 %s368_s25, 4  ;;  %s369_s13 = scalar_lea.sflag [#allocation3], %s368_s25 }
  0x8a   : > { %s372_s5 = scalar_lea.vmem [#allocation2], %s1963_s23 }
  0x8b   : > { %1595 = dma.done.wait (%p1848_p9), %s369_s13, 256  }
  0x8c   : > { %1597 = vsyncadd (%p1848_p9), %s369_s13, 4294967040  ;;  %s378_s18 = sand.u32 1, %s1815_s8   ;;  %s380_s9 = sand.u32 1, %s1620_s21  }
  0x8d   : > { %s1063_s27 = sshll.u32 %s380_s9, 4  ;;  %s379_s10 = scalar_lea.sflag [#allocation5], %s378_s18 }
  0x8e   : > { %s1972_s6 = scalar_lea.vmem [#allocation4], %s1063_s27 }
  0x8f   : > { %1599 = dma.done.wait (%p1863_p12), %s379_s10, 512  }
  0x90   : > { %1601 = vsyncadd (%p1863_p12), %s379_s10, 4294966784  ;;  %s1978_s11 = scalar_lea.vmem [#allocation6], %s1063_s27  ;;  %s399_s17 = scalar_lea.sflag [#allocation8], %s378_s18 }
  0x91   : > { %s1980_s15 = scalar_lea.vmem [#allocation7], %s1063_s27 }
  0x92   : > { %1603 = dma.done.wait (%p1863_p12), %s399_s17, 272  }
  0x93   : > { %1605 = vsyncadd (%p1863_p12), %s399_s17, 4294967024  ;;  %s2222_s8 = sld [smem:[#allocation14_spill]]  ;;  %s1987_s0 = scalar_lea.vmem [#allocation9], %s380_s9 }
  0x94   : > { %s1991_s16 = smov 0  }
  0x99   : > { %s454_s24 = sand.u32 1, %s2222_s8  }
  0x9a   : > { %s1066_s2 = sshll.u32 %s454_s24, 4 }
  0x9b   : > { %s1989_s3 = scalar_lea.vmem [#allocation10], %s1066_s2  }
  0x9c LB: >> { %v1299_v0 = vld [vmem:[%s1972_s6] ss:$0 sm:$0xff]  ;;  %s1067_s26 = sshll.u32 %s1668_s16, 3  ;;  %v1302_v3 = vld [vmem:[%s1972_s6 + $0x1] ss:$0 sm:$0xff]  ;;  %s482_s16 = sadd.s32 1, %s1668_s16   ;;  %s1668_s16 = sphi %s1991_s16, %s482_s16  }
  0x9d   : >> { %v1300_v1 = vld [vmem:[%s1978_s11] ss:$0 sm:$0xff]  ;;  %s484_s28 = scalar_lea.vmem %s372_s5, %s1067_s26 [#allocation2]  ;;  %v1303_v4 = vld [vmem:[%s1978_s11 + $0x1] ss:$0 sm:$0xff]  ;;  %v1305_v8 = vld [vmem:[%s1972_s6 + $0x2] ss:$0 sm:$0xff]  ;;  %s667_s1 = scalar_lea.vmem %s1989_s3, %s1067_s26 [#allocation10] }
  0x9e   : >> { %v2003_v2 = vld [vmem:[%s484_s28] sm:$0xff]  ;;  %v1323_v55 = vld [vmem:[%s1972_s6 + $0x8] ss:$0 sm:$0xff]  ;;  %v1326_v63 = vld [vmem:[%s1972_s6 + $0x9] ss:$0 sm:$0xff]  ;;  %p479_p9 = scmp.ge.s32.totalorder %s482_s16, 2  }
  0x9f   : >> { %v494_v5 = vmul.f32 %v1299_v0, %v2003_v2  ;;  %v1301_v6 = vld [vmem:[%s1980_s15] ss:$0 sm:$0xff]  ;;  %v505_v7 = vmul.f32 %v1302_v3, %v2003_v2  ;;  %v1306_v9 = vld [vmem:[%s1978_s11 + $0x2] ss:$0 sm:$0xff]  ;;  %v1304_v12 = vld [vmem:[%s1980_s15 + $0x1] ss:$0 sm:$0xff]  ;;  %v516_v14 = vmul.f32 %v1305_v8, %v2003_v2  ;;  %v582_v62 = vmul.f32 %v1323_v55, %v2003_v2 }
  0xa0   : >> { %v1298_v10 = vld [vmem:[%s1987_s0] ss:$0 sm:$0xff]  ;;  %v1308_v15 = vld [vmem:[%s1972_s6 + $0x3] ss:$0 sm:$0xff]  ;;  %v1307_v18 = vld [vmem:[%s1980_s15 + $0x2] ss:$0 sm:$0xff] }
  0xa1   : >> { %v496_v11 = vadd.f32 %v1300_v1, %v494_v5  ;;  %v507_v13 = vadd.f32 %v1303_v4, %v505_v7  ;;  %v1309_v16 = vld [vmem:[%s1978_s11 + $0x3] ss:$0 sm:$0xff]  ;;  %v518_v20 = vadd.f32 %v1306_v9, %v516_v14  ;;  %v527_v21 = vmul.f32 %v1308_v15, %v2003_v2  ;;  %v1311_v24 = vld [vmem:[%s1972_s6 + $0x4] ss:$0 sm:$0xff]  ;;  %v1314_v31 = vld [vmem:[%s1972_s6 + $0x5] ss:$0 sm:$0xff] }
  0xa2   : >> { %v1310_v23 = vld [vmem:[%s1980_s15 + $0x3] ss:$0 sm:$0xff]  ;;  %v1312_v25 = vld [vmem:[%s1978_s11 + $0x4] ss:$0 sm:$0xff]  ;;  %v538_v30 = vmul.f32 %v1311_v24, %v2003_v2  ;;  %v1315_v32 = vld [vmem:[%s1978_s11 + $0x5] ss:$0 sm:$0xff]  ;;  %v549_v38 = vmul.f32 %v1314_v31, %v2003_v2  ;;  %v593_v7 = vmul.f32 %v1326_v63, %v2003_v2 }
  0xa3   : >> { %v497_v17 = vmax.f32 %v496_v11, 0.0  ;;  %v508_v19 = vmax.f32 %v507_v13, 0.0  ;;  %v519_v27 = vmax.f32 %v518_v20, 0.0  ;;  %v529_v28 = vadd.f32 %v1309_v16, %v527_v21  ;;  %v1313_v35 = vld [vmem:[%s1980_s15 + $0x4] ss:$0 sm:$0xff] }
  0xa4   : >> { %v540_v37 = vadd.f32 %v1312_v25, %v538_v30  ;;  %v1317_v39 = vld [vmem:[%s1972_s6 + $0x6] ss:$0 sm:$0xff]  ;;  %v1316_v41 = vld [vmem:[%s1980_s15 + $0x5] ss:$0 sm:$0xff]  ;;  %v551_v45 = vadd.f32 %v1315_v32, %v549_v38  ;;  %v1320_v48 = vld [vmem:[%s1972_s6 + $0x7] ss:$0 sm:$0xff] }
  0xa5   : >> { %v499_v22 = vmul.f32 %v1301_v6, %v497_v17  ;;  %v510_v26 = vmul.f32 %v1304_v12, %v508_v19  ;;  %v521_v33 = vmul.f32 %v1307_v18, %v519_v27  ;;  %v530_v34 = vmax.f32 %v529_v28, 0.0  ;;  %v1318_v42 = vld [vmem:[%s1978_s11 + $0x6] ss:$0 sm:$0xff]  ;;  %v1321_v49 = vld [vmem:[%s1978_s11 + $0x7] ss:$0 sm:$0xff] }
  0xa6   : >> { %v541_v44 = vmax.f32 %v540_v37, 0.0  ;;  %v560_v46 = vmul.f32 %v1317_v39, %v2003_v2  ;;  %v1319_v47 = vld [vmem:[%s1980_s15 + $0x6] ss:$0 sm:$0xff]  ;;  %v552_v52 = vmax.f32 %v551_v45, 0.0  ;;  %v571_v54 = vmul.f32 %v1320_v48, %v2003_v2  ;;  %v1324_v56 = vld [vmem:[%s1978_s11 + $0x8] ss:$0 sm:$0xff] }
  0xa7   : >> { %v500_v29 = vadd.f32 %v1298_v10, %v499_v22  ;;  %v532_v40 = vmul.f32 %v1310_v23, %v530_v34  ;;  %v1322_v60 = vld [vmem:[%s1980_s15 + $0x7] ss:$0 sm:$0xff]  ;;  %v1325_v3 = vld [vmem:[%s1980_s15 + $0x8] ss:$0 sm:$0xff]  ;;  %v1327_v4 = vld [vmem:[%s1978_s11 + $0x9] ss:$0 sm:$0xff]  ;;  %v584_v6 = vadd.f32 %v1324_v56, %v582_v62 }
  0xa8   : >> { %v543_v51 = vmul.f32 %v1313_v35, %v541_v44  ;;  %v562_v53 = vadd.f32 %v1318_v42, %v560_v46  ;;  %v554_v58 = vmul.f32 %v1316_v41, %v552_v52  ;;  %v573_v61 = vadd.f32 %v1321_v49, %v571_v54  ;;  %v1328_v9 = vld [vmem:[%s1980_s15 + $0x9] ss:$0 sm:$0xff]  ;;  %v1329_v10 = vld [vmem:[%s1972_s6 + $0xa] ss:$0 sm:$0xff]  ;;  %v1332_v16 = vld [vmem:[%s1972_s6 + $0xb] ss:$0 sm:$0xff] }
  0xa9   : >> { %v511_v36 = vadd.f32 %v510_v26, %v500_v29  ;;  %v1330_v11 = vld [vmem:[%s1978_s11 + $0xa] ss:$0 sm:$0xff]  ;;  %v585_v13 = vmax.f32 %v584_v6, 0.0  ;;  %v595_v14 = vadd.f32 %v1327_v4, %v593_v7  ;;  %v604_v15 = vmul.f32 %v1329_v10, %v2003_v2  ;;  %v1333_v17 = vld [vmem:[%s1978_s11 + $0xb] ss:$0 sm:$0xff] }
  0xaa   : >> { %v563_v59 = vmax.f32 %v562_v53, 0.0  ;;  %v574_v5 = vmax.f32 %v573_v61, 0.0  ;;  %v1331_v21 = vld [vmem:[%s1980_s15 + $0xa] ss:$0 sm:$0xff]  ;;  %v615_v23 = vmul.f32 %v1332_v16, %v2003_v2  ;;  %v1335_v24 = vld [vmem:[%s1972_s6 + $0xc] ss:$0 sm:$0xff] }
  0xab   : >> { %v522_v43 = vadd.f32 %v521_v33, %v511_v36  ;;  %v587_v19 = vmul.f32 %v1325_v3, %v585_v13  ;;  %v596_v20 = vmax.f32 %v595_v14, 0.0  ;;  %v606_v22 = vadd.f32 %v1330_v11, %v604_v15  ;;  %v1334_v27 = vld [vmem:[%s1980_s15 + $0xb] ss:$0 sm:$0xff]  ;;  %v1336_v28 = vld [vmem:[%s1978_s11 + $0xc] ss:$0 sm:$0xff] }
  0xac   : >> { %v565_v1 = vmul.f32 %v1319_v47, %v563_v59  ;;  %v576_v12 = vmul.f32 %v1322_v60, %v574_v5  ;;  %v617_v30 = vadd.f32 %v1333_v17, %v615_v23  ;;  %v626_v31 = vmul.f32 %v1335_v24, %v2003_v2  ;;  %v1337_v33 = vld [vmem:[%s1980_s15 + $0xc] ss:$0 sm:$0xff]  ;;  %v1338_v34 = vld [vmem:[%s1972_s6 + $0xd] ss:$0 sm:$0xff]  ;;  %v1342_v41 = vld [vmem:[%s1978_s11 + $0xe] ss:$0 sm:$0xff] }
  0xad   : >> { %v533_v50 = vadd.f32 %v532_v40, %v522_v43  ;;  %v598_v26 = vmul.f32 %v1328_v9, %v596_v20  ;;  %v607_v29 = vmax.f32 %v606_v22, 0.0  ;;  %v1339_v35 = vld [vmem:[%s1978_s11 + $0xd] ss:$0 sm:$0xff]  ;;  %v637_v39 = vmul.f32 %v1338_v34, %v2003_v2  ;;  %v1341_v40 = vld [vmem:[%s1972_s6 + $0xe] ss:$0 sm:$0xff] }
  0xae   : >> { %v618_v37 = vmax.f32 %v617_v30, 0.0  ;;  %v628_v38 = vadd.f32 %v1336_v28, %v626_v31  ;;  %v1340_v45 = vld [vmem:[%s1980_s15 + $0xd] ss:$0 sm:$0xff]  ;;  %v648_v47 = vmul.f32 %v1341_v40, %v2003_v2  ;;  %v1344_v48 = vld [vmem:[%s1972_s6 + $0xf] ss:$0 sm:$0xff] }
  0xaf   : >> { %v544_v57 = vadd.f32 %v543_v51, %v533_v50  ;;  %v609_v36 = vmul.f32 %v1331_v21, %v607_v29  ;;  %v639_v46 = vadd.f32 %v1339_v35, %v637_v39  ;;  %v1345_v51 = vld [vmem:[%s1978_s11 + $0xf] ss:$0 sm:$0xff]  ;;  %v1343_v54 = vld [vmem:[%s1980_s15 + $0xe] ss:$0 sm:$0xff]  ;;  %v659_v55 = vmul.f32 %v1344_v48, %v2003_v2 }
  0xb0   : >> { %v620_v43 = vmul.f32 %v1334_v27, %v618_v37  ;;  %v629_v44 = vmax.f32 %v628_v38, 0.0  ;;  %v650_v53 = vadd.f32 %v1342_v41, %v648_v47  ;;  %v1346_v60 = vld [vmem:[%s1980_s15 + $0xf] ss:$0 sm:$0xff] }
  0xb1   : >> { %v555_v0 = vadd.f32 %v554_v58, %v544_v57  ;;  %v640_v52 = vmax.f32 %v639_v46, 0.0  ;;  %v661_v59 = vadd.f32 %v1345_v51, %v659_v55 }
  0xb2   : >> { %v631_v50 = vmul.f32 %v1337_v33, %v629_v44  ;;  %v651_v58 = vmax.f32 %v650_v53, 0.0 }
  0xb3   : >> { %v566_v8 = vadd.f32 %v565_v1, %v555_v0  ;;  %v642_v57 = vmul.f32 %v1340_v45, %v640_v52  ;;  %v662_v63 = vmax.f32 %v661_v59, 0.0 }
  0xb4   : >> { %v653_v62 = vmul.f32 %v1343_v54, %v651_v58 }
  0xb5   : >> { %v577_v18 = vadd.f32 %v576_v12, %v566_v8  ;;  %v664_v1 = vmul.f32 %v1346_v60, %v662_v63 }
  0xb7   : >> { %v588_v25 = vadd.f32 %v587_v19, %v577_v18 }
  0xb9   : >> { %v599_v32 = vadd.f32 %v598_v26, %v588_v25 }
  0xbb   : >> { %v610_v42 = vadd.f32 %v609_v36, %v599_v32 }
  0xbd   : >> { %v621_v49 = vadd.f32 %v620_v43, %v610_v42 }
  0xbf   : >> { %v632_v56 = vadd.f32 %v631_v50, %v621_v49 }
  0xc1   : >> { %v643_v61 = vadd.f32 %v642_v57, %v632_v56 }
  0xc3   : >> { %v654_v0 = vadd.f32 %v653_v62, %v643_v61 }
  0xc5   : >> { %v665_v3 = vadd.f32 %v664_v1, %v654_v0  ;;  %481 = sbr.rel (!%p479_p9) target bundleno = 156 (0x9c), region = 197 }
  0xc7   : >> { %v666_v4 = vmax.f32 %v665_v3, 0.0 }
  0xc9   : >> { %668 = vst [vmem:[%s667_s1] sm:$0xff] %v666_v4 }
  0xca   : > { %675 = sbr.rel (!%p1882_p5) target bundleno = 251 (0xfb), region = 71  ;;  %s2224_s20 = sld [smem:[#allocation18_spill]] (%p1882_p5) }
  0xcb   : > { %s2225_s12 = sld [smem:[#allocation19_spill]] (%p1882_p5) }
  0xcc   : > { %s2226_s14 = sld [smem:[#allocation20_spill]] (%p1882_p5) }
  0xcd   : > { %s2227_s5 = sld [smem:[#allocation37_spill]] (%p1882_p5) }
  0xd0   : > { %s1069_s30 = sshll.u32 %s2224_s20, 1  ;;  %s1087_s4 = sshll.u32 %s2224_s20, 2 }
  0xd1   : > { %s677_s19 = ssub.s32 3, %s1069_s30  ;;  %s683_s25 = sadd.s32 %s2225_s12, %s1087_s4 }
  0xd2   : > { %p678_p10 = scmp.lt.s32.totalorder %s677_s19, 2  ;;  %s1090_s13 = smul.u32 6, %s2226_s14 }
  0xd4   : > { %s2257_s19 = smov (!%p678_p10, %s677_s19), 2  ;;  %s685_s18 = sadd.s32 %s1090_s13, %s683_s25 }
  0xd5   : > { %s1070_s9 = sshll.u32 %s2257_s19, 3  ;;  %s1073_s27 = sshll.u32 %s685_s18, 3 }
  0xd6   : > { %s2086_s6 = scalar_lea.vmem %s2227_s5, %s1073_s27   ;;  %p1074_p12 = scmp.eq.s32.totalorder %s1070_s9, 0 }
  0xd7   : > { %s2089_s11 = sshrl.u32 (!%p1074_p12), %s2257_s19, 1 }
  0xd8   : > { %690 = sbr.rel (%p1074_p12) target bundleno = 251 (0xfb), region = 75  ;;  %p1075_p5 = scmp.le.s32.totalorder (!%p1074_p12), %s2089_s11, 0 }
  0xdd   : > { %928 = sbr.rel (%p1075_p5) target bundleno = 234 (0xea), region = 202  ;;  %s1670_s17 = smov (!%p1075_p5), %s2086_s6  }
  0xde   : > { %s1674_s15 = smov (!%p1075_p5), %s1989_s3   ;;  %s1678_s8 = smov (!%p1075_p5), 0  }
  0xdf   : > { %s1682_s24 = smov (!%p1075_p5), 0  }
  0xe2 LB: >> { %v755_v2 = vld [vmem:[%s1676_s15] sm:$0xff]  ;;  %v757_v5 = vld [vmem:[%s1676_s15 + $0x8] sm:$0xff]  ;;  %s759_s2 = sadd.s32 1, %s1680_s8  ;;  %s749_s24 = sadd.s32 1, %s1684_s24   ;;  %s1684_s24 = sphi %s1682_s24, %s749_s24   ;;  %s1680_s8 = sphi %s1678_s8, %s1679_s8   ;;  %s1676_s15 = sphi %s1674_s15, %s764_s15   ;;  %s1672_s17 = sphi %s1670_s17, %s765_s17  }
  0xe3   : >> { %756 = vst [vmem:[%s1672_s17] sm:$0xff] %v755_v2  ;;  %p760_p0 = scmp.ge.s32.totalorder %s759_s2, %s2089_s11  ;;  %p748_p1 = scmp.ge.s32.totalorder %s749_s24, %s2089_s11 }
  0xe4   : >> { %758 = vst [vmem:[%s1672_s17 + $0x10] sm:$0xff] %v757_v5 }
  0xe5   : >> { %s2259_s2 = smov (%p760_p0, %s759_s2), 0  ;;  %751 = sbr.rel (!%p748_p1) target bundleno = 226 (0xe2), region = 208 }
  0xe6   : >> { %s1076_s0 = sshll.u32 %s2259_s2, 4  ;;  %s1077_s16 = sshll.u32 %s2259_s2, 5 }
  0xe7   : >> { %s764_s15 = scalar_lea.vmem %s1989_s3, %s1076_s0 [#allocation10]   ;;  %s765_s17 = scalar_lea.vmem %s2086_s6, %s1077_s16  }
  0xe8   : >> { %s1679_s8 = smov %s2259_s2  }
  0xea PF: > { %s2099_s26 = sand.u32 1, %s2257_s19   ;;  %s1088_s28 = sshll.u32 %s2089_s11, 4 }
  0xeb   : > { %s2103_s1 = scalar_lea.vmem %s1989_s3, %s1088_s28 [#allocation10]   ;;  %s1089_s29 = sshll.u32 %s2089_s11, 5 }
  0xec   : > { %s772_s20 = scalar_lea.vmem %s2086_s6, %s1089_s29   ;;  %p1081_p2 = scmp.le.s32.totalorder %s2099_s26, 0 }
  0xed   : > { %s1686_s12 = smov (!%p1081_p2), %s772_s20   ;;  %s1690_s14 = smov (!%p1081_p2), %s2103_s1  }
  0xee   : > { %942 = sbr.rel (%p1081_p2) target bundleno = 251 (0xfb), region = 213  ;;  %s1694_s30 = smov (!%p1081_p2), 0  }
  0xef   : > { %s1698_s4 = smov (!%p1081_p2), 0  }
  0xf3 LB: >> { %v782_v6 = vld [vmem:[%s1692_s14] sm:$0xff]  ;;  %s784_s3 = sadd.s32 1, %s1696_s30  ;;  %s776_s4 = sadd.s32 1, %s1700_s4   ;;  %s1700_s4 = sphi %s1698_s4, %s776_s4   ;;  %s1696_s30 = sphi %s1694_s30, %s1695_s30   ;;  %s1692_s14 = sphi %s1690_s14, %s789_s14   ;;  %s1688_s12 = sphi %s1686_s12, %s790_s12  }
  0xf4   : >> { %783 = vst [vmem:[%s1688_s12] sm:$0xff] %v782_v6  ;;  %p785_p3 = scmp.ge.s32.totalorder %s784_s3, %s2099_s26  ;;  %p775_p6 = scmp.ge.s32.totalorder %s776_s4, %s2099_s26 }
  0xf6   : >> { %s2261_s3 = smov (%p785_p3, %s784_s3), 0  ;;  %778 = sbr.rel (!%p775_p6) target bundleno = 243 (0xf3), region = 219 }
  0xf7   : >> { %s1082_s19 = sshll.u32 %s2261_s3, 3  ;;  %s1083_s25 = sshll.u32 %s2261_s3, 4 }
  0xf8   : >> { %s789_s14 = scalar_lea.vmem %s2103_s1, %s1082_s19 [#allocation10]   ;;  %s790_s12 = scalar_lea.vmem %s772_s20, %s1083_s25  }
  0xf9   : >> { %s1695_s30 = smov %s2261_s3  }
  0xfb PF: > { %s24_s7 = sadd.s32 1, %s1664_s7   ;;  %s2229_s18 = sld [smem:[#allocation15_spill]] }
  0xfc   : > { %p2113_p7 = scmp.ge.s32.totalorder %s24_s7, 10   ;;  %s2230_s19 = sld [smem:[#allocation30_spill]] }
  0xfd   : > { %s2231_s9 = sld [smem:[#allocation28_spill]]  ;;  %s2241_s20 = smov %s1620_s21 }
  0xfe   : > { %s2232_s23 = sld [smem:[#allocation16_spill]]  ;;  %s2242_s21 = smov %s1624_s22 }
  0xff   : > { %s2233_s24 = sld [smem:[#allocation17_spill]] }
 0x100   : > { %s2234_s25 = sld [smem:[#allocation29_spill]] }
 0x101   : > { %s2235_s26 = sld [smem:[#allocation21_spill]] }
 0x102   : > { %s2236_s27 = sld [smem:[#allocation22_spill]]  ;;  %23 = sbr.rel (!%p2113_p7) target bundleno = 20 (0x14), region = 230 }
 0x103   : > { %s2237_s28 = sld [smem:[#allocation23_spill]]  ;;  %s2243_s22 = smov %s2231_s9 }
 0x104   : > { %s2238_s29 = sld [smem:[#allocation24_spill]] }
 0x105   : > { %s2239_s30 = sld [smem:[#allocation25_spill]] }
 0x106   : > { %s2240_s6 = sld [smem:[#allocation26_spill]] }
 0x107   :  { %806 = vsyncpa [#allocation3], 1 }
 0x108   :  { %808 = vsyncpa [#allocation3 + $0x1], 1 }
 0x109   :  { %809 = vsyncpa [#allocation5], 1 }
 0x10a   :  { %811 = vsyncpa [#allocation5 + $0x1], 1 }
 0x10b   :  { %812 = vsyncpa [#allocation8], 1 }
 0x10c   :  { %814 = vsyncpa [#allocation8 + $0x1], 1 }

</bundles_post_ra>
